<compile_context>
chip_gen: v7x
topology: tpu7x:2x2x1
jax: 0.10.0
libtpu: 0.0.40
codegen_flags: <defaults>
</compile_context>

<pallas_src>
import functools
import math

import jax
import jax.numpy as jnp
import numpy as np
from jax.experimental import pallas as pl
from jax.experimental.pallas import tpu as pltpu


_MIN_GRID_STEPS = 4  # keep >= 4 channel tiles when C allows: pipelining + cross-core sharding.


def _cdiv(a, b):
    return -(-a // b)


def _round_up(x, m):
    return _cdiv(x, m) * m


def _sublane_multiple(dtype):
    # Sublane packing unit for the second-to-last block dim: 8 (f32), 16 (bf16), 32 (int8/fp8).
    return {4: 8, 2: 16, 1: 32}.get(jnp.dtype(dtype).itemsize, 8)


def _vmem_budget():
    """Generation-aware scoped-VMEM limit and working-set budget for block sizing."""
    try:
        cap = int(pltpu.get_tpu_info().vmem_capacity_bytes)   # 128 MiB v5e/v6e, 64 MiB v7x
    except Exception:
        cap = 64 * 1024 * 1024                                # conservative fallback (v7x-sized)
    limit = min((cap * 3) // 4, 100 * 1024 * 1024)            # explicit scoped limit w/ headroom
    budget = (limit * 4) // 5                                  # target for blocks + f32 temps
    return int(limit), int(budget)


def _pick_tile_c(c, cmult, lin_bpc, quad_bpc2, budget, max_tile_c=None):
    """Channel-tile size: a multiple of `cmult` (or full C), sized so the per-step working set
    (lin_bpc * tile + quad_bpc2 * tile^2 bytes) fits the VMEM budget, and capped so the 1-D
    channel grid has >= _MIN_GRID_STEPS steps whenever C allows it."""
    if c <= cmult:
        return int(c)
    tile = (c // cmult) * cmult
    if max_tile_c is not None:
        tile = min(tile, max(cmult, (int(max_tile_c) // cmult) * cmult))
    tile = min(tile, max(cmult, _round_up(_cdiv(c, _MIN_GRID_STEPS), cmult)))
    while tile > cmult and tile * lin_bpc + tile * tile * quad_bpc2 > budget:
        tile -= cmult
    # TODO(synk): if even the minimum tile exceeds the budget, switch to the two-pass fallback.
    return int(tile)


def _finite_or_zero(v):
    # Robust NaN/Inf scrub (abs/compare/select only): NaN and Inf compare False -> 0.0.
    return jnp.where(jnp.abs(v) < jnp.float32(3.0e38), v, jnp.float32(0.0))


# --------------------------------------------------------------------------------------------
# Kernel bodies
# --------------------------------------------------------------------------------------------

def _lrelu_bn_blocked_kernel(x_ref, gamma_ref, beta_ref, o_ref, *,
                             negative_slope, eps, inv_m, reduce_axes):
    """Blocked layout: x_ref is (N, TILE_C, L) (L % 128 == 0) or (N, TILE_C) for 2D inputs."""
    x = x_ref[...].astype(jnp.float32)
    y = jnp.where(x >= 0, x, negative_slope * x)                 # LeakyReLU
    # One-pass batch statistics (f32): sum and sum-of-squares, leading (cheap VPU) axis first.
    s1 = y
    s2 = y * y
    for ax in reduce_axes:
        s1 = jnp.sum(s1, axis=ax, keepdims=True)
        s2 = jnp.sum(s2, axis=ax, keepdims=True)
    mean = s1 * inv_m
    var = jnp.maximum(s2 * inv_m - mean * mean, 0.0)             # biased variance, clamped >= 0
    scale = gamma_ref[...] * jax.lax.rsqrt(var + eps)            # rsqrt -> EUP slot
    shift = beta_ref[...] - mean * scale
    o_ref[...] = (y * scale + shift).astype(o_ref.dtype)


def _lrelu_bn_lane_dense_kernel(x_ref, seg_ref, gamma_ref, beta_ref, o_ref, *,
                                negative_slope, eps, inv_m):
    """Lane-dense layout for small L: x_ref is an (N, TILE_C*L) block of the (N, C*L) view.

    seg_ref:  (TILE_C*L, TILE_C) 0/1 lane->channel map (same block every step, stays resident).
    gamma_ref / beta_ref: (1, TILE_C*L) per-lane affine params (gamma/beta repeated L times).
    """
    x = x_ref[...].astype(jnp.float32)
    y = jnp.where(x >= 0, x, negative_slope * x)                 # LeakyReLU
    # Batch (sublane) reduction first, one f32 row per lane.
    s1 = jnp.sum(y, axis=0, keepdims=True)                       # (1, G)
    s2 = jnp.sum(y * y, axis=0, keepdims=True)                   # (1, G)
    # A partial last channel tile reads unspecified padding; zero non-finite garbage so the
    # segment matmul below cannot contaminate valid channels (0 * NaN == NaN otherwise).
    s1 = _finite_or_zero(s1)
    s2 = _finite_or_zero(s2)
    seg = seg_ref[...]                                           # (G, TILE_C)
    mean_c = jnp.dot(s1, seg, preferred_element_type=jnp.float32) * inv_m      # (1, TILE_C)
    sq_c = jnp.dot(s2, seg, preferred_element_type=jnp.float32) * inv_m        # (1, TILE_C)
    var_c = jnp.maximum(sq_c - mean_c * mean_c, 0.0)
    inv_c = jax.lax.rsqrt(var_c + eps)                           # per-channel 1/std (EUP)
    # Broadcast per-channel stats back to the lane-dense row layout (contraction over channels).
    dn = (((1,), (1,)), ((), ()))
    mean_row = jax.lax.dot_general(mean_c, seg, dn, preferred_element_type=jnp.float32)  # (1, G)
    inv_row = jax.lax.dot_general(inv_c, seg, dn, preferred_element_type=jnp.float32)    # (1, G)
    scale_row = gamma_ref[...] * inv_row
    shift_row = beta_ref[...] - mean_row * scale_row
    o_ref[...] = (y * scale_row + shift_row).astype(o_ref.dtype)


# --------------------------------------------------------------------------------------------
# Wrappers
# --------------------------------------------------------------------------------------------

def _compiler_params(vmem_limit):
    return pltpu.CompilerParams(
        dimension_semantics=("parallel",),   # channel tiles are independent
        vmem_limit_bytes=vmem_limit,
    )


def _lrelu_bn_3d_lane_dense(x, gamma, beta, negative_slope, eps, max_tile_c):
    """(N, C, L) with small L: operate on the contiguous (N, C*L) view (unmasked lane-dense IO)."""
    n, c, l = x.shape
    vmem_limit, budget = _vmem_budget()
    itemsize = jnp.dtype(x.dtype).itemsize
    lane_mult = 128 // math.gcd(l, 128)           # keeps TILE_C*L a multiple of 128 lanes
    cmult = max(lane_mult, 8)
    # 2x double-buffered in + out blocks, ~3 live f32 temps, plus the per-lane gamma/beta rows.
    lin = l * (n * (4 * itemsize + 12) + 32)
    quad = 2 * l * 4                               # seg (TILE_C*L, TILE_C) f32, double-buffered
    tile_c = _pick_tile_c(c, cmult, lin, quad, budget, max_tile_c)
    grid_c = _cdiv(c, tile_c)
    g = tile_c * l

    x2 = x.reshape(n, c * l)                       # contiguous view: no transpose / data movement
    ch = np.arange(g) // l
    seg = jnp.asarray((ch[:, None] == np.arange(tile_c)[None, :]).astype(np.float32))
    gamma_row = jnp.repeat(gamma.astype(jnp.float32), l).reshape(1, c * l)
    beta_row = jnp.repeat(beta.astype(jnp.float32), l).reshape(1, c * l)

    kernel = functools.partial(
        _lrelu_bn_lane_dense_kernel,
        negative_slope=float(negative_slope), eps=float(eps), inv_m=1.0 / float(n * l))

    out2 = pl.pallas_call(
        kernel,
        out_shape=jax.ShapeDtypeStruct((n, c * l), x.dtype),
        grid=(grid_c,),
        in_specs=[
            pl.BlockSpec((n, g), lambda i: (0, i)),
            pl.BlockSpec((g, tile_c), lambda i: (0, 0)),   # same block every step -> resident
            pl.BlockSpec((1, g), lambda i: (0, i)),
            pl.BlockSpec((1, g), lambda i: (0, i)),
        ],
        out_specs=pl.BlockSpec((n, g), lambda i: (0, i)),
        compiler_params=_compiler_params(vmem_limit),
    )(x2, seg, gamma_row, beta_row)
    return out2.reshape(n, c, l)


def _lrelu_bn_3d_blocked(x, gamma, beta, negative_slope, eps, max_tile_c):
    """(N, C, L) with L >= 128 (lane-dense already): blocks of (N, TILE_C, L)."""
    n, c, l = x.shape
    vmem_limit, budget = _vmem_budget()
    itemsize = jnp.dtype(x.dtype).itemsize
    cmult = _sublane_multiple(x.dtype)             # TILE_C sits on sublanes of the x block
    lin = n * l * (4 * itemsize + 12)              # 2x dbl-buffered in/out + ~3 f32 temps
    tile_c = _pick_tile_c(c, cmult, lin, 0, budget, max_tile_c)
    grid_c = _cdiv(c, tile_c)

    gamma_b = gamma.astype(jnp.float32).reshape(1, c, 1)
    beta_b = beta.astype(jnp.float32).reshape(1, c, 1)
    kernel = functools.partial(
        _lrelu_bn_blocked_kernel,
        negative_slope=float(negative_slope), eps=float(eps),
        inv_m=1.0 / float(n * l), reduce_axes=(0, 2))

    return pl.pallas_call(
        kernel,
        out_shape=jax.ShapeDtypeStruct(x.shape, x.dtype),
        grid=(grid_c,),
        in_specs=[
            pl.BlockSpec((n, tile_c, l), lambda i: (0, i, 0)),
            pl.BlockSpec((1, tile_c, 1), lambda i: (0, i, 0)),
            pl.BlockSpec((1, tile_c, 1), lambda i: (0, i, 0)),
        ],
        out_specs=pl.BlockSpec((n, tile_c, l), lambda i: (0, i, 0)),
        compiler_params=_compiler_params(vmem_limit),
    )(x, gamma_b, beta_b)


def _lrelu_bn_2d(x, gamma, beta, negative_slope, eps, max_tile_c):
    """(N, C): channels on lanes, batch on sublanes."""
    n, c = x.shape
    vmem_limit, budget = _vmem_budget()
    itemsize = jnp.dtype(x.dtype).itemsize
    lin = n * (4 * itemsize + 12)
    tile_c = _pick_tile_c(c, 128, lin, 0, budget, max_tile_c)
    grid_c = _cdiv(c, tile_c)

    gamma_b = gamma.astype(jnp.float32).reshape(1, c)
    beta_b = beta.astype(jnp.float32).reshape(1, c)
    kernel = functools.partial(
        _lrelu_bn_blocked_kernel,
        negative_slope=float(negative_slope), eps=float(eps),
        inv_m=1.0 / float(n), reduce_axes=(0,))

    return pl.pallas_call(
        kernel,
        out_shape=jax.ShapeDtypeStruct(x.shape, x.dtype),
        grid=(grid_c,),
        in_specs=[
            pl.BlockSpec((n, tile_c), lambda i: (0, i)),
            pl.BlockSpec((1, tile_c), lambda i: (0, i)),
            pl.BlockSpec((1, tile_c), lambda i: (0, i)),
        ],
        out_specs=pl.BlockSpec((n, tile_c), lambda i: (0, i)),
        compiler_params=_compiler_params(vmem_limit),
    )(x, gamma_b, beta_b)


def lrelu_bn(x, gamma, beta, *, negative_slope=0.01, eps=1e-5, max_tile_c=None):
    """LeakyReLU -> BatchNorm1d (training-mode batch stats), matching the torch forward.

    x: (N, C) or (N, C, L);  gamma, beta: (C,)  (BatchNorm1d weight / bias).
    """
    if x.ndim == 3:
        n, c, l = x.shape
        if l % 128 == 0:
            return _lrelu_bn_3d_blocked(x, gamma, beta, negative_slope, eps, max_tile_c)
        if l < 128:
            return _lrelu_bn_3d_lane_dense(x, gamma, beta, negative_slope, eps, max_tile_c)
        return _lrelu_bn_3d_blocked(x, gamma, beta, negative_slope, eps, max_tile_c)
    if x.ndim == 2:
        return _lrelu_bn_2d(x, gamma, beta, negative_slope, eps, max_tile_c)
    raise ValueError("BatchNorm1d expects 2D (N, C) or 3D (N, C, L) input")


def _reference(x, gamma, beta, negative_slope=0.01, eps=1e-5):
    xf = x.astype(jnp.float32)
    y = jnp.where(xf >= 0, xf, negative_slope * xf)
    axes = (0,) if y.ndim == 2 else (0, 2)
    mean = jnp.mean(y, axis=axes, keepdims=True)
    var = jnp.mean(jnp.square(y - mean), axis=axes, keepdims=True)   # biased variance
    yhat = (y - mean) * jax.lax.rsqrt(var + eps)
    g = gamma.astype(jnp.float32).reshape((1, -1) + (1,) * (y.ndim - 2))
    b = beta.astype(jnp.float32).reshape((1, -1) + (1,) * (y.ndim - 2))
    return (g * yhat + b).astype(x.dtype)


if __name__ == "__main__":
    key = jax.random.PRNGKey(0)
    k1, k2, k3, k4, k5 = jax.random.split(key, 5)

    def check(x, gamma, beta, rtol, atol):
        out = jax.block_until_ready(lrelu_bn(x, gamma, beta, negative_slope=0.01, eps=1e-5))
        ref = _reference(x, gamma, beta, negative_slope=0.01, eps=1e-5)
        np.testing.assert_allclose(np.asarray(out.astype(jnp.float32)),
                                   np.asarray(ref.astype(jnp.float32)),
                                   rtol=rtol, atol=atol)
        return out

    # (1) 3D, small L (16 < 128): lane-dense flattened path, 2 channel tiles of 8.
    x = jax.random.normal(k1, (2, 16, 16), jnp.float32)
    gamma = jnp.linspace(0.5, 1.5, 16).astype(jnp.float32)     # bn.weight
    beta = jnp.linspace(-0.25, 0.25, 16).astype(jnp.float32)   # bn.bias
    check(x, gamma, beta, rtol=1e-2, atol=1e-2)  # loose: stat matmuls may use bf16 MXU passes

    # (2) same path with a partial last channel tile (C=20 -> tiles of 8, 3 grid steps).
    x = jax.random.normal(k2, (4, 20, 16), jnp.float32)
    gamma = jnp.linspace(0.75, 1.25, 20).astype(jnp.float32)
    beta = jnp.linspace(-0.1, 0.1, 20).astype(jnp.float32)
    check(x, gamma, beta, rtol=1e-2, atol=1e-2)

    # (3) 3D, L a multiple of 128: blocked (N, TILE_C, L) path, 2 channel tiles.
    x = jax.random.normal(k3, (2, 16, 128), jnp.float32)
    gamma = jnp.linspace(0.5, 1.5, 16).astype(jnp.float32)
    beta = jnp.linspace(-0.25, 0.25, 16).astype(jnp.float32)
    check(x, gamma, beta, rtol=1e-4, atol=1e-4)

    # (4) 2D (N, C): channels on lanes, batch on sublanes.
    x = jax.random.normal(k4, (8, 4), jnp.float32)
    gamma = jnp.ones((4,), jnp.float32)
    beta = jnp.zeros((4,), jnp.float32)
    check(x, gamma, beta, rtol=1e-4, atol=1e-4)

    # (5) bf16 input on the blocked path (dtype-aware 16-row sublane channel tiles).
    x = jax.random.normal(k5, (2, 32, 128), jnp.float32).astype(jnp.bfloat16)
    gamma = jnp.linspace(0.5, 1.5, 32).astype(jnp.float32)
    beta = jnp.linspace(-0.25, 0.25, 32).astype(jnp.float32)
    check(x, gamma, beta, rtol=2e-2, atol=2e-2)

    print("KERNEL_OK")
</pallas_src>

<mosaic_0001>
module attributes {stable_mosaic.version = 11 : i64} {
  func.func @_lrelu_bn_lane_dense_kernel(%arg0: i32, %arg1: memref<2x128xf32, #tpu.memory_space<vmem>>, %arg2: memref<128x8xf32, #tpu.memory_space<vmem>>, %arg3: memref<1x128xf32, #tpu.memory_space<vmem>>, %arg4: memref<1x128xf32, #tpu.memory_space<vmem>>, %arg5: memref<2x128xf32, #tpu.memory_space<vmem>>) attributes {dimension_semantics = [#tpu.dimension_semantics<parallel>], iteration_bounds = array<i64: 2>, scalar_prefetch = 0 : i64, scratch_operands = 0 : i64, tpu.core_type = #tpu.core_type<tc>, window_params = [{transform_indices = @transform_0, window_bounds = array<i64: 2, 128>}, {pipeline_mode = #tpu.pipeline_mode<synchronous>, transform_indices = @transform_1, window_bounds = array<i64: 128, 8>}, {transform_indices = @transform_2, window_bounds = array<i64: 1, 128>}, {transform_indices = @transform_3, window_bounds = array<i64: 1, 128>}, {transform_indices = @transform_4, window_bounds = array<i64: 2, 128>}]} {
    %c0 = arith.constant 0 : index
    %c0_0 = arith.constant 0 : index
    %0 = vector.load %arg1[%c0, %c0_0] : memref<2x128xf32, #tpu.memory_space<vmem>>, vector<2x128xf32>
    %cst = arith.constant 0.000000e+00 : f32
    %1 = vector.broadcast %cst : f32 to vector<2x128xf32>
    %2 = arith.cmpf oge, %0, %1 : vector<2x128xf32>
    %cst_1 = arith.constant 0.00999999977 : f32
    %3 = vector.broadcast %cst_1 : f32 to vector<2x128xf32>
    %4 = arith.mulf %3, %0 : vector<2x128xf32>
    %5 = arith.select %2, %0, %4 : vector<2x128xi1>, vector<2x128xf32>
    %cst_2 = arith.constant dense<0.000000e+00> : vector<128xf32>
    %6 = vector.multi_reduction <add>, %5, %cst_2 [0] : vector<2x128xf32> to vector<128xf32>
    %7 = vector.shape_cast %6 : vector<128xf32> to vector<1x128xf32>
    %8 = arith.mulf %5, %5 : vector<2x128xf32>
    %cst_3 = arith.constant dense<0.000000e+00> : vector<128xf32>
    %9 = vector.multi_reduction <add>, %8, %cst_3 [0] : vector<2x128xf32> to vector<128xf32>
    %10 = vector.shape_cast %9 : vector<128xf32> to vector<1x128xf32>
    %11 = math.absf %7 : vector<1x128xf32>
    %cst_4 = arith.constant 3.000000e+38 : f32
    %12 = vector.broadcast %cst_4 : f32 to vector<1x128xf32>
    %13 = arith.cmpf olt, %11, %12 : vector<1x128xf32>
    %cst_5 = arith.constant 0.000000e+00 : f32
    %14 = vector.broadcast %cst_5 : f32 to vector<1x128xf32>
    %15 = arith.select %13, %7, %14 : vector<1x128xi1>, vector<1x128xf32>
    %16 = math.absf %10 : vector<1x128xf32>
    %cst_6 = arith.constant 3.000000e+38 : f32
    %17 = vector.broadcast %cst_6 : f32 to vector<1x128xf32>
    %18 = arith.cmpf olt, %16, %17 : vector<1x128xf32>
    %cst_7 = arith.constant 0.000000e+00 : f32
    %19 = vector.broadcast %cst_7 : f32 to vector<1x128xf32>
    %20 = arith.select %18, %10, %19 : vector<1x128xi1>, vector<1x128xf32>
    %c0_8 = arith.constant 0 : index
    %c0_9 = arith.constant 0 : index
    %21 = vector.load %arg2[%c0_8, %c0_9] : memref<128x8xf32, #tpu.memory_space<vmem>>, vector<128x8xf32>
    %cst_10 = arith.constant dense<0.000000e+00> : vector<1x8xf32>
    %22 = tpu.matmul %15, %21, %cst_10 {dimension_numbers = #tpu.dot_dimension_numbers<[1], [0], [0], [1], [0, 0, 1, 1], [], []>} : vector<1x128xf32>, vector<128x8xf32>, vector<1x8xf32> -> vector<1x8xf32>
    %cst_11 = arith.constant 3.125000e-02 : f32
    %23 = vector.broadcast %cst_11 : f32 to vector<1x8xf32>
    %24 = arith.mulf %22, %23 : vector<1x8xf32>
    %cst_12 = arith.constant dense<0.000000e+00> : vector<1x8xf32>
    %25 = tpu.matmul %20, %21, %cst_12 {dimension_numbers = #tpu.dot_dimension_numbers<[1], [0], [0], [1], [0, 0, 1, 1], [], []>} : vector<1x128xf32>, vector<128x8xf32>, vector<1x8xf32> -> vector<1x8xf32>
    %cst_13 = arith.constant 3.125000e-02 : f32
    %26 = vector.broadcast %cst_13 : f32 to vector<1x8xf32>
    %27 = arith.mulf %25, %26 : vector<1x8xf32>
    %28 = arith.mulf %24, %24 : vector<1x8xf32>
    %29 = arith.subf %27, %28 : vector<1x8xf32>
    %cst_14 = arith.constant 0.000000e+00 : f32
    %30 = vector.broadcast %cst_14 : f32 to vector<1x8xf32>
    %31 = arith.maximumf %29, %30 : vector<1x8xf32>
    %cst_15 = arith.constant 9.99999974E-6 : f32
    %32 = vector.broadcast %cst_15 : f32 to vector<1x8xf32>
    %33 = arith.addf %31, %32 : vector<1x8xf32>
    %34 = math.rsqrt %33 : vector<1x8xf32>
    %cst_16 = arith.constant dense<0.000000e+00> : vector<1x128xf32>
    %35 = tpu.matmul %24, %21, %cst_16 {dimension_numbers = #tpu.dot_dimension_numbers<[1], [1], [0], [0], [0, 0, 1, 0], [], []>} : vector<1x8xf32>, vector<128x8xf32>, vector<1x128xf32> -> vector<1x128xf32>
    %cst_17 = arith.constant dense<0.000000e+00> : vector<1x128xf32>
    %36 = tpu.matmul %34, %21, %cst_17 {dimension_numbers = #tpu.dot_dimension_numbers<[1], [1], [0], [0], [0, 0, 1, 0], [], []>} : vector<1x8xf32>, vector<128x8xf32>, vector<1x128xf32> -> vector<1x128xf32>
    %c0_18 = arith.constant 0 : index
    %c0_19 = arith.constant 0 : index
    %37 = vector.load %arg3[%c0_18, %c0_19] : memref<1x128xf32, #tpu.memory_space<vmem>>, vector<1x128xf32>
    %38 = arith.mulf %37, %36 : vector<1x128xf32>
    %c0_20 = arith.constant 0 : index
    %c0_21 = arith.constant 0 : index
    %39 = vector.load %arg4[%c0_20, %c0_21] : memref<1x128xf32, #tpu.memory_space<vmem>>, vector<1x128xf32>
    %40 = arith.mulf %35, %38 : vector<1x128xf32>
    %41 = arith.subf %39, %40 : vector<1x128xf32>
    %42 = vector.broadcast %38 : vector<1x128xf32> to vector<2x128xf32>
    %43 = arith.mulf %5, %42 : vector<2x128xf32>
    %44 = vector.broadcast %41 : vector<1x128xf32> to vector<2x128xf32>
    %45 = arith.addf %43, %44 : vector<2x128xf32>
    %c0_22 = arith.constant 0 : index
    %c0_23 = arith.constant 0 : index
    %46 = vector.load %arg5[%c0_22, %c0_23] : memref<2x128xf32, #tpu.memory_space<vmem>>, vector<2x128xf32>
    tpu.vector_store %arg5[%c0_22, %c0_23], %45 {strides = array<i32>} : memref<2x128xf32, #tpu.memory_space<vmem>>, vector<2x128xf32>,
    return
  }
  func.func @transform_0(%arg0: i32) -> (i32, i32) {
    %c0_i32 = arith.constant 0 : i32
    %c0_i32_0 = arith.constant 0 : i32
    return %c0_i32, %arg0 : i32, i32
  }
  func.func @transform_1(%arg0: i32) -> (i32, i32) {
    %c0_i32 = arith.constant 0 : i32
    %c0_i32_0 = arith.constant 0 : i32
    %c0_i32_1 = arith.constant 0 : i32
    return %c0_i32, %c0_i32_0 : i32, i32
  }
  func.func @transform_2(%arg0: i32) -> (i32, i32) {
    %c0_i32 = arith.constant 0 : i32
    %c0_i32_0 = arith.constant 0 : i32
    return %c0_i32, %arg0 : i32, i32
  }
  func.func @transform_3(%arg0: i32) -> (i32, i32) {
    %c0_i32 = arith.constant 0 : i32
    %c0_i32_0 = arith.constant 0 : i32
    return %c0_i32, %arg0 : i32, i32
  }
  func.func @transform_4(%arg0: i32) -> (i32, i32) {
    %c0_i32 = arith.constant 0 : i32
    %c0_i32_0 = arith.constant 0 : i32
    return %c0_i32, %arg0 : i32, i32
  }
}

</mosaic_0001>

<bundles_post_ra>
// kernel: tpu_custom_call.1
= control target key start
LH: loop header
LB: loop body
LE: loop exit
PB: predicated region body
PF: predicated region fallthrough
CT: control target
= control target key end

     0   :  { %9 = vsyncpa [#allocation3], 0  ;;  %s1494_s0 = inlined_call_operand.vmem [shape: f32[2,256], index: 0, kind: input, shape index: {}]   ;;  %s1495_s1 = inlined_call_operand.vmem [shape: f32[128,8], index: 1, kind: input, shape index: {}]   ;;  %s1496_s2 = inlined_call_operand.vmem [shape: f32[1,256], index: 2, kind: input, shape index: {}]   ;;  %s1497_s3 = inlined_call_operand.vmem [shape: f32[1,256], index: 3, kind: input, shape index: {}]   ;;  %s1498_s4 = inlined_call_operand.hbm [shape: f32[2,256], index: 4, kind: output, shape index: {}]  }
   0x1   :  { %11 = vsyncpa [#allocation3 + $0x1], 0  ;;  %s1219_s15 = smov 0   ;;  %s1221_s16 = smov 0  }
   0x2   :  { %s1223_s17 = smov 0   ;;  %s1225_s18 = smov 0  }
   0x3 LB: > { %s1240_s19 = sadd.s32 4294967295, %s1188_s18   ;;  %s716_s20 = sadd.s32 4294967294, %s1188_s18   ;;  %s1188_s18 = sphi %s1225_s18, %s1506_s18   ;;  %s1184_s17 = sphi %s1223_s17, %s1505_s17   ;;  %s1180_s16 = sphi %s1221_s16, %s1504_s16   ;;  %s1176_s15 = sphi %s1219_s15, %s1503_s15  }
   0x4   : > { %s1244_s21 = sadd.s32 1, %s1188_s18   ;;  %s123_s22 = sadd.s32 1, %s1184_s17 }
   0x5   : > { %s120_s23 = ssub.s32 %s1188_s18, %s1244_s21  ;;  %p133_p0 = scmp.ne.s32.totalorder %s1184_s17, %s1180_s16 }
   0x6   : > { %p121_p1 = scmp.eq.s32.totalorder %s120_s23, 0  ;;  %p134_p2 = scmp.eq.s32.totalorder %s1240_s19, 1 }
   0x7   : > { %p139_p3 = scmp.ne.s32.totalorder %s1180_s16, %s1176_s15  ;;  %p140_p4 = scmp.eq.s32.totalorder %s716_s20, 1 }
   0x8   : > { %s1255_s24 = scalar_select %p121_p1, %s1184_s17, %s123_s22  }
   0x9   : > { %p1257_p5 = por %p134_p2, %p133_p0  ;;  %p1261_p6 = por %p140_p4, %p139_p3 }
   0xa   : > { %p719_p7 = scmp.ge.s32.totalorder %s1188_s18, 1  ;;  %p180_p8 = scmp.lt.s32.totalorder %s1188_s18, 3 }
   0xc   : > { %p181_p9 = pnand %p719_p7, %p180_p8 }
   0xd   : > { %v247_v0 = vld [vmem:[%s1495_s1] sm:$0xff] (!%p181_p9)  ;;  %v248_v1 = vld [vmem:[%s1495_s1 + $0x8] sm:$0xff] (!%p181_p9)  ;;  %v249_v2 = vld [vmem:[%s1495_s1 + $0x10] sm:$0xff] (!%p181_p9)  ;;  %v1190_v3 = vmov (!%p181_p9), 0.0|0.0   ;;  %p211_p10 = scmp.lt.s32.totalorder (!%p181_p9), %s1240_s19, 1  ;;  %vm1191_vm0 = vmmov (!%p181_p9), 0   ;;  %v611_v60 = vlaneseq (!%p181_p9) }
   0xe   : > { %184 = sbr.rel (%p181_p9) target bundleno = 516 (0x204), region = 36  ;;  %970 = vmatprep.subr.bf16.mxu0 (!%p181_p9), %v1190_v3  ;;  %v1277_v4 = vpack.c.bf16 (!%p181_p9), %v248_v1, %v247_v0  ;;  %994 = vmatprep.subr.bf16.mxu1 (!%p181_p9), %v1190_v3  ;;  %v250_v5 = vld [vmem:[%s1495_s1 + $0x18] sm:$0xff] (!%p181_p9)  ;;  %v1192_v6 = vmov (!%p181_p9), 0.0   ;;  %v251_v8 = vld [vmem:[%s1495_s1 + $0x20] sm:$0xff] (!%p181_p9)  ;;  %v252_v9 = vld [vmem:[%s1495_s1 + $0x28] sm:$0xff] (!%p181_p9)  ;;  %vm225_vm2 = vcmask (!%p181_p9), 1041408  }
   0xf   : > { %862 = vmatprep.mubr.msk.f32.mxu0 (!%p181_p9), %vm1191_vm0, %v1192_v6  ;;  %897 = vmatprep.mubr.msk.f32.mxu1 (!%p181_p9), %vm1191_vm0, %v1192_v6  ;;  %v1290_v7 = vpack.c.bf16 (!%p181_p9), %v250_v5, %v249_v2  ;;  %v1309_v10 = vpack.c.bf16 (!%p181_p9), %v252_v9, %v251_v8  ;;  %v253_v12 = vld [vmem:[%s1495_s1 + $0x30] sm:$0xff] (!%p181_p9)  ;;  %v254_v13 = vld [vmem:[%s1495_s1 + $0x38] sm:$0xff] (!%p181_p9)  ;;  %v255_v19 = vld [vmem:[%s1495_s1 + $0x40] sm:$0xff] (!%p181_p9)  ;;  %vm410_vm5 = vcmask (!%p181_p9), 64512   ;;  %v612_v61 = vshrl.u32 (!%p181_p9), %v611_v60, 7  ;;  %s208_s8 = sand.u32 (!%p181_p9), 1, %s1180_s16  }
  0x10   : > { %972 = vmatpush3.bf16.msra.mxu0 (!%p181_p9), %v1277_v4  ;;  %996 = vmatpush3.bf16.msra.mxu1 (!%p181_p9), %v1277_v4  ;;  %v1323_v16 = vpack.c.bf16 (!%p181_p9), %v254_v13, %v253_v12  ;;  %v256_v20 = vld [vmem:[%s1495_s1 + $0x48] sm:$0xff] (!%p181_p9)  ;;  %v257_v26 = vld [vmem:[%s1495_s1 + $0x50] sm:$0xff] (!%p181_p9)  ;;  %v258_v27 = vld [vmem:[%s1495_s1 + $0x58] sm:$0xff] (!%p181_p9)  ;;  %s720_s13 = sshll.u32 (!%p181_p9), %s208_s8, 1  ;;  %s626_s28 = scalar_lea.sflag (!%p181_p9), [#allocation3], %s208_s8 }
  0x11   : > { %973 = vmatprep.subr.bf16.mxu0 (!%p181_p9), %v1190_v3  ;;  %997 = vmatprep.subr.bf16.mxu1 (!%p181_p9), %v1190_v3  ;;  %v1338_v25 = vpack.c.bf16 (!%p181_p9), %v256_v20, %v255_v19  ;;  %v986_v32 = vpack.c.bf16 (!%p181_p9), %v258_v27, %v257_v26  ;;  %v259_v33 = vld [vmem:[%s1495_s1 + $0x60] sm:$0xff] (!%p181_p9)  ;;  %v260_v34 = vld [vmem:[%s1495_s1 + $0x68] sm:$0xff] (!%p181_p9)  ;;  %v261_v40 = vld [vmem:[%s1495_s1 + $0x70] sm:$0xff] (!%p181_p9)  ;;  %v613_v63 = vsub.s32 (!%p181_p9), 0, %v612_v61  ;;  %s210_s20 = scalar_lea.vmem (!%p181_p9), [#allocation2], %s720_s13 }
  0x12   : > { %v989_v38 = vpack.c.bf16 (!%p181_p9), %v260_v34, %v259_v33  ;;  %v262_v41 = vld [vmem:[%s1495_s1 + $0x78] sm:$0xff] (!%p181_p9)  ;;  %vm1376_vm6 = vmpackc.low (!%p181_p9), %vm410_vm5, %vm410_vm5  ;;  %s639_s22 = sshll.u32 (!%p181_p9), %s210_s20, 4  ;;  %s1454_s22 = int_to_ptr.vmem [resolvable:$true] %s639_s22 }
  0x13   : > { %v992_v43 = vpack.c.bf16 (!%p181_p9), %v262_v41, %v261_v40  ;;  %s1126_s29 = scalar_lea.vmem (!%p181_p9), %s1454_s22, 32 }
  0x14   : > { %975 = vmatpush3.bf16.msra.mxu0 (!%p181_p9), %v1290_v7  ;;  %999 = vmatpush3.bf16.msra.mxu1 (!%p181_p9), %v1290_v7  ;;  %p1127_p11 = scmp.ne.s32.totalorder (!%p181_p9), %s1454_s22, %s1126_s29 }
  0x15   : > { %s1293_s9 = scalar_select %p211_p10, %s1240_s19, 1  ;;  %976 = vmatprep.subr.bf16.mxu0 %v1190_v3  ;;  %1000 = vmatprep.subr.bf16.mxu1 %v1190_v3 }
  0x16   : > { %p1128_p12 = pnand %p1127_p11, %p1257_p5 }
  0x17   : > { %s721_s14 = sshll.u32 %s1293_s9, 1  ;;  %s217_s7 = scalar_lea.vmem %s1496_s2, %s1293_s9 }
  0x18   : > { %s214_s23 = scalar_lea.vmem %s1494_s0, %s721_s14  ;;  %978 = vmatpush3.bf16.msra.mxu0 %v1309_v10  ;;  %1002 = vmatpush3.bf16.msra.mxu1 %v1309_v10  ;;  %v605_v62 = vld [vmem:[%s217_s7] sm:$0x1]  ;;  %s220_s12 = scalar_lea.vmem %s1497_s3, %s1293_s9 }
  0x19   : > { %v221_v11 = vld [vmem:[%s214_s23] sm:$0x3]  ;;  %979 = vmatprep.subr.bf16.mxu0 %v1190_v3  ;;  %1003 = vmatprep.subr.bf16.mxu1 %v1190_v3  ;;  %s759_s14 = sshll.u32 %s1240_s19, 5  ;;  %p1129_p13 = pneg %p1128_p12 }
  0x1a   : > { %vm222_vm1 = vcmp.ge.f32.partialorder %v221_v11, 0.0  ;;  %v223_v14 = vmul.f32 0.01, %v221_v11  ;;  %s1452_s9 = scalar_lea.hbm %s1498_s4, %s759_s14  ;;  %s1193_s19 = smov [#allocation2]  }
  0x1b   : > { %s1130_s30 = sshll.u32 %s1193_s19, 4  ;;  %s1131_s30 = int_to_ptr.vmem [resolvable:$false] %s1130_s30 }
  0x1c   : > { %v1319_v15 = vsel %vm222_vm1, %v221_v11, %v223_v14  ;;  %981 = vmatpush3.bf16.msra.mxu0 %v1323_v16  ;;  %1005 = vmatpush3.bf16.msra.mxu1 %v1323_v16  ;;  %s1132_s5 = scalar_lea.vmem %s1131_s30, 64  ;;  %p1133_p0 = scmp.lt.s32.totalorder %s1454_s22, %s1131_s30 }
  0x1d   : > { %v226_v17 = vsel %vm225_vm2, %v1319_v15, 0.0  ;;  %v233_v18 = vmul.f32 %v1319_v15, %v1319_v15  ;;  %982 = vmatprep.subr.bf16.mxu0 %v1190_v3  ;;  %1006 = vmatprep.subr.bf16.mxu1 %v1190_v3  ;;  %p1134_p1 = scmp.lt.s32.totalorder %s1132_s5, %s1126_s29 }
  0x1e   : > { %v227_v21 = vrot.slane %v226_v17, 4 }
  0x1f   : > { %v234_v22 = vsel %vm225_vm2, %v233_v18, 0.0  ;;  %p1135_p2 = por %p1134_p1, %p1133_p0 }
  0x20   : > { %v228_v23 = vadd.f32 %v227_v21, %v226_v17  ;;  %v235_v24 = vrot.slane %v234_v22, 4  ;;  %984 = vmatpush3.bf16.msra.mxu0 %v1338_v25  ;;  %1008 = vmatpush3.bf16.msra.mxu1 %v1338_v25 }
  0x21   : > { %985 = vmatprep.subr.bf16.mxu0 %v1190_v3  ;;  %1009 = vmatprep.subr.bf16.mxu1 %v1190_v3  ;;  %p1136_p3 = pnand %p1135_p2, %p1129_p13 }
  0x22   : > { %v229_v28 = vrot.slane %v228_v23, 2  ;;  %v236_v29 = vadd.f32 %v235_v24, %v234_v22 }
  0x24   : > { %v230_v30 = vadd.f32 %v229_v28, %v228_v23  ;;  %v237_v31 = vrot.slane %v236_v29, 2  ;;  %987 = vmatpush3.bf16.msra.mxu0 %v986_v32  ;;  %1011 = vmatpush3.bf16.msra.mxu1 %v986_v32 }
  0x25   : > { %988 = vmatprep.subr.bf16.mxu0 %v1190_v3  ;;  %1012 = vmatprep.subr.bf16.mxu1 %v1190_v3 }
  0x26   : > { %v231_v35 = vrot.slane %v230_v30, 1  ;;  %v238_v36 = vadd.f32 %v237_v31, %v236_v29 }
  0x28   : > { %v239_v37 = vrot.slane %v238_v36, 1  ;;  %v232_v39 = vadd.f32 %v231_v35, %v230_v30  ;;  %990 = vmatpush3.bf16.msra.mxu0 %v989_v38  ;;  %1014 = vmatpush3.bf16.msra.mxu1 %v989_v38 }
  0x29   : > { %991 = vmatprep.subr.bf16.mxu0 %v1190_v3  ;;  %1015 = vmatprep.subr.bf16.mxu1 %v1190_v3 }
  0x2a   : > { %v240_v42 = vadd.f32 %v239_v37, %v238_v36  ;;  %v241_v44 = vand.u32 2147483647, %v232_v39 }
  0x2c   : > { %v244_v45 = vand.u32 2147483647, %v240_v42  ;;  %993 = vmatpush3.bf16.msra.mxu0 %v992_v43  ;;  %1017 = vmatpush3.bf16.msra.mxu1 %v992_v43  ;;  %vm242_vm3 = vcmp.lt.f32.partialorder %v241_v44, 3e+38 }
  0x2d   : > { %1018 = vmatprep.subr.bf16.mxu0 %v1190_v3  ;;  %1050 = vmatprep.subr.bf16.mxu1 %v1190_v3 }
  0x2e   : > { %vm245_vm4 = vcmp.lt.f32.partialorder %v244_v45, 3e+38 }
  0x2f   : > { %863 = vmatmul.mubr.msk.f32.vlgmr.msra.gmra.mrb[0].mxu0 %vm242_vm3, %v232_v39  ;;  %898 = vmatmul.mubr.msk.f32.vlgmr.msra.gmra.mrb[0].mxu1 %vm245_vm4, %v240_v42 }
  0x30   : > { %932 = vmatprep.mubr.msk.f32.mxu0 %vm1191_vm0, %v1192_v6  ;;  %967 = vmatprep.mubr.msk.f32.mxu1 %vm1191_vm0, %v1192_v6 }
  0x35   : > { %1021 = vmatpush3.bf16.xpose.msk.msra.mxu0 %vm1376_vm6, %v1277_v4  ;;  %1053 = vmatpush3.bf16.xpose.msk.msra.mxu1 %vm1376_vm6, %v1277_v4 }
  0x36   : > { %1022 = vmatprep.subr.bf16.mxu0 %v1190_v3  ;;  %1054 = vmatprep.subr.bf16.mxu1 %v1190_v3 }
  0x3d   : > { %1025 = vmatpush3.bf16.xpose.msk.msra.mxu0 %vm1376_vm6, %v1290_v7  ;;  %1057 = vmatpush3.bf16.xpose.msk.msra.mxu1 %vm1376_vm6, %v1290_v7 }
  0x3e   : > { %1026 = vmatprep.subr.bf16.mxu0 %v1190_v3  ;;  %1058 = vmatprep.subr.bf16.mxu1 %v1190_v3 }
  0x45   : > { %1029 = vmatpush3.bf16.xpose.msk.msra.mxu0 %vm1376_vm6, %v1309_v10  ;;  %1061 = vmatpush3.bf16.xpose.msk.msra.mxu1 %vm1376_vm6, %v1309_v10 }
  0x46   : > { %1030 = vmatprep.subr.bf16.mxu0 %v1190_v3  ;;  %1062 = vmatprep.subr.bf16.mxu1 %v1190_v3 }
  0x4d   : > { %1033 = vmatpush3.bf16.xpose.msk.msra.mxu0 %vm1376_vm6, %v1323_v16  ;;  %1065 = vmatpush3.bf16.xpose.msk.msra.mxu1 %vm1376_vm6, %v1323_v16 }
  0x4e   : > { %1034 = vmatprep.subr.bf16.mxu0 %v1190_v3  ;;  %1066 = vmatprep.subr.bf16.mxu1 %v1190_v3 }
  0x55   : > { %1037 = vmatpush3.bf16.xpose.msk.msra.mxu0 %vm1376_vm6, %v1338_v25  ;;  %1069 = vmatpush3.bf16.xpose.msk.msra.mxu1 %vm1376_vm6, %v1338_v25 }
  0x56   : > { %1038 = vmatprep.subr.bf16.mxu0 %v1190_v3  ;;  %1070 = vmatprep.subr.bf16.mxu1 %v1190_v3 }
  0x5d   : > { %1041 = vmatpush3.bf16.xpose.msk.msra.mxu0 %vm1376_vm6, %v986_v32  ;;  %1073 = vmatpush3.bf16.xpose.msk.msra.mxu1 %vm1376_vm6, %v986_v32 }
  0x5e   : > { %1042 = vmatprep.subr.bf16.mxu0 %v1190_v3  ;;  %1074 = vmatprep.subr.bf16.mxu1 %v1190_v3 }
  0x65   : > { %1045 = vmatpush3.bf16.xpose.msk.msra.mxu0 %vm1376_vm6, %v989_v38  ;;  %1077 = vmatpush3.bf16.xpose.msk.msra.mxu1 %vm1376_vm6, %v989_v38 }
  0x66   : > { %1046 = vmatprep.subr.bf16.mxu0 %v1190_v3  ;;  %1078 = vmatprep.subr.bf16.mxu1 %v1190_v3  ;;  %v607_v3 = vld [vmem:[%s220_s12] sm:$0x1] }
  0x6d   : > { %1049 = vmatpush3.bf16.xpose.msk.msra.mxu0 %vm1376_vm6, %v992_v43  ;;  %1081 = vmatpush3.bf16.xpose.msk.msra.mxu1 %vm1376_vm6, %v992_v43 }
 0x102   : > { %v329_v47 = vpop.f32.mrb[0].mxu0  ;;  %v400_v48 = vpop.f32.mrb[0].mxu1 }
 0x103   : > { %v333_v49 = vmul.f32 0.03125, %v329_v47  ;;  %v864_v50 = vpop.f32.mrb[1].mxu0  ;;  %v404_v51 = vmul.f32 0.03125, %v400_v48  ;;  %v899_v52 = vpop.f32.mrb[1].mxu1 }
 0x105   : > { %v405_v53 = vmul.f32 %v333_v49, %v333_v49  ;;  %933 = vmatmul.mubr.msk.f32.vlgmr.msra.gmra.mrb[2].mxu0 %vm410_vm5, %v333_v49 }
 0x107   : > { %v406_v54 = vsub.f32 %v404_v51, %v405_v53 }
 0x109   : > { %v407_v55 = vmax.f32 %v406_v54, 0.0 }
 0x10b   : > { %v408_v56 = vadd.f32 1e-05, %v407_v55 }
 0x10d   : > { %1124 = vrsqrt.f32 %v408_v56 }
 0x117   : > { %v1125_v57 = vpop.eup %1124 }
 0x118   : > { %968 = vmatmul.mubr.msk.f32.vlgmr.msra.gmra.mrb[2].mxu1 %vm410_vm5, %v1125_v57 }
 0x1d8   : > { %v528_v58 = vpop.f32.mrb[2].mxu0 }
 0x1d9   : > { %v934_v59 = vpop.f32.mrb[3].mxu0 }
 0x1eb   : > { %v601_v0 = vpop.f32.mrb[2].mxu1 }
 0x1ec   : > { %v606_v1 = vmul.f32 %v605_v62, %v601_v0  ;;  %v969_v2 = vpop.f32.mrb[3].mxu1 }
 0x1ee   : > { %v608_v4 = vmul.f32 %v606_v1, %v528_v58  ;;  %v614_v5 = vrot.slane %v606_v1, %v613_v63 }
 0x1f0   : > { %v609_v6 = vsub.f32 %v607_v3, %v608_v4  ;;  %v616_v7 = vmul.f32 %v614_v5, %v1319_v15 }
 0x1f2   : > { %v621_v8 = vrot.slane %v609_v6, %v613_v63 }
 0x1f4   : > { %v623_v9 = vadd.f32 %v621_v8, %v616_v7 }
 0x1f6   : > { %624 = vst [vmem:[%s210_s20] sm:$0x3] %v623_v9 }
 0x1f7   : > { %1139 = shalt.err (!%p1136_p3)
}
 0x1f8   : > { %s1140_s6 = scalar_lea.hbm %s1452_s9, 32  ;;  %s1144_s10 = scalar_lea.hbm %s1498_s4, 64 }
 0x1f9   : > { %p1141_p4 = scmp.ne.s32.totalorder %s1452_s9, %s1140_s6  ;;  %p1145_p9 = scmp.lt.u32.totalorder %s1452_s9, %s1498_s4 }
 0x1fa   : > { %p1146_p10 = scmp.lt.u32.totalorder %s1144_s10, %s1140_s6  ;;  %p1148_p12 = scmp.lt.u32.totalorder %s1140_s6, %s1452_s9 }
 0x1fb   : > { %p1142_p7 = pnand %p1141_p4, %p1257_p5 }
 0x1fc   : > { %p1147_p11 = por %p1146_p10, %p1145_p9 }
 0x1fd   : > { %p1143_p8 = pneg %p1142_p7 }
 0x1fe   : > { %p1149_p13 = por %p1148_p12, %p1147_p11 }
 0x200   : > { %p1150_p0 = pnand %p1149_p13, %p1143_p8 }
 0x202   : > { %1153 = shalt.err (!%p1150_p0)
}
 0x203   : > { %1082 = dma.vmem_to_hbm [thread:$0]  (%p1257_p5), %s1454_s22, 32, %s1452_s9, %s626_s28  }
 0x204 PF: > { %p1088_p1 = scmp.ge.s32.totalorder %s1188_s18, 2  ;;  %s651_s13 = sand.u32 1, %s1176_s15  }
 0x205   : > { %s652_s14 = scalar_lea.sflag [#allocation3], %s651_s13 }
 0x206   : > { %p1085_p2 = pnand %p1088_p1, %p1261_p6 }
 0x208   : > { %1171 = dma.done.wait (!%p1085_p2), %s652_s14, 32  }
 0x209   : > { %1173 = vsyncadd (!%p1085_p2), %s652_s14, 4294967264  ;;  %p14_p3 = scmp.ge.s32.totalorder %s1244_s21, 4   ;;  %s1503_s15 = smov %s1180_s16 }
 0x20a   : > { %s1504_s16 = smov %s1184_s17  ;;  %s1505_s17 = smov %s1255_s24 }
 0x20b   : > { %s1506_s18 = smov %s1244_s21  ;;  %16 = sbr.rel (!%p14_p3) target bundleno = 3 (0x3), region = 77 }
 0x212   :  { %657 = vsyncpa [#allocation3], 1 }
 0x213   :  { %659 = vsyncpa [#allocation3 + $0x1], 1 }

</bundles_post_ra>
